<compile_context>
chip_gen: v5e
topology: v5e:2x2
jax: 0.10.0
libtpu: 0.0.40
codegen_flags: <defaults>
</compile_context>

<pallas_src>
import math

import jax
import jax.numpy as jnp
from jax.experimental import pallas as pl
from jax.experimental.pallas import tpu as pltpu


_SMALL_FAST_PATH_BYTES = 256 * 1024     # below this: metadata-only jnp.reshape
_CHUNK_SPLIT_BYTES = 8 * 1024 * 1024    # above this: multi-DMA copy fan-out
_N_SPLIT_CHUNKS = 4                     # descriptors in flight for huge copies


def _resolve_shape(total, shape):
    """torch .view semantics, including a single -1 wildcard."""
    shape = tuple(int(s) for s in shape)
    if -1 in shape:
        assert shape.count(-1) == 1, "only one -1 allowed"
        rest = math.prod(s for s in shape if s != -1)
        assert rest > 0 and total % rest == 0, "shape mismatch"
        i = shape.index(-1)
        shape = shape[:i] + (total // rest,) + shape[i + 1:]
    assert math.prod(shape) == total, "shape mismatch"
    return shape


# ----------------------------------------------------------------------------
# Zero-copy path: output buffer aliases the input buffer; nothing to move.
# ----------------------------------------------------------------------------
def _alias_identity_kernel(x_hbm, o_hbm):
    # Output IS the input (input_output_aliases={0: 0}); a contiguous .view
    # needs no data movement, so the body is intentionally empty.
    del x_hbm, o_hbm


def _reshape_alias(x, out_shape):
    x_view = jnp.reshape(x, out_shape)            # metadata-only, row-major
    return pl.pallas_call(
        _alias_identity_kernel,
        out_shape=jax.ShapeDtypeStruct(out_shape, x.dtype),
        in_specs=[pl.BlockSpec(memory_space=pl.ANY)],
        out_specs=pl.BlockSpec(memory_space=pl.ANY),
        input_output_aliases={0: 0},
    )(x_view)


# ----------------------------------------------------------------------------
# Explicit-copy path (fresh output buffer): HBM -> HBM DMA, no VMEM, no grid.
# ----------------------------------------------------------------------------
def _copy_whole_kernel(x_hbm, o_hbm, sem):
    cp = pltpu.make_async_copy(x_hbm, o_hbm, sem)
    cp.start()
    cp.wait()


def _copy_chunked_kernel(x_hbm, o_hbm, sems):
    n = x_hbm.shape[0]                            # static chunk count
    copies = [pltpu.make_async_copy(x_hbm.at[i], o_hbm.at[i], sems.at[i])
              for i in range(n)]
    for cp in copies:                             # start-all ...
        cp.start()
    for cp in copies:                             # ... then wait-all
        cp.wait()


def _reshape_copy(x, out_shape):
    total = x.size
    itemsize = x.dtype.itemsize
    nbytes = total * itemsize
    cost = pl.CostEstimate(flops=0, transcendentals=0, bytes_accessed=2 * nbytes)

    chunk = total // _N_SPLIT_CHUNKS
    use_split = (nbytes >= _CHUNK_SPLIT_BYTES
                 and total % _N_SPLIT_CHUNKS == 0
                 and (chunk * itemsize) % 512 == 0)   # 512 B-aligned split

    if not use_split:
        # Single whole-buffer DMA.  The pallas output already has the final
        # shape; the input reshape is a metadata-only contiguous view.
        return pl.pallas_call(
            _copy_whole_kernel,
            out_shape=jax.ShapeDtypeStruct(out_shape, x.dtype),
            in_specs=[pl.BlockSpec(memory_space=pl.ANY)],
            out_specs=pl.BlockSpec(memory_space=pl.ANY),
            scratch_shapes=[pltpu.SemaphoreType.DMA(())],
            cost_estimate=cost,
        )(jnp.reshape(x, out_shape))

    # Very large buffer: a few aligned chunk DMAs in flight at once.
    chunk_shape = (chunk // 128, 128) if chunk % 128 == 0 else (chunk,)
    x_chunks = jnp.reshape(x, (_N_SPLIT_CHUNKS,) + chunk_shape)   # metadata
    out = pl.pallas_call(
        _copy_chunked_kernel,
        out_shape=jax.ShapeDtypeStruct((_N_SPLIT_CHUNKS,) + chunk_shape, x.dtype),
        in_specs=[pl.BlockSpec(memory_space=pl.ANY)],
        out_specs=pl.BlockSpec(memory_space=pl.ANY),
        scratch_shapes=[pltpu.SemaphoreType.DMA((_N_SPLIT_CHUNKS,))],
        cost_estimate=cost,
    )(x_chunks)
    return jnp.reshape(out, out_shape)            # metadata only


# ----------------------------------------------------------------------------
# Public wrapper (== _Reshape_1d.forward)
# ----------------------------------------------------------------------------
def reshape_1d(x, target_shape, *, copy=False, small_bytes=_SMALL_FAST_PATH_BYTES):
    """Pallas equivalent of x.view(target_shape) for contiguous x."""
    out_shape = _resolve_shape(x.size, target_shape)
    nbytes = x.size * x.dtype.itemsize

    if x.size == 0:
        # Zero-element guard: nothing to move, pure metadata.
        return jnp.reshape(x, out_shape)

    if copy:
        return _reshape_copy(x, out_shape)

    if nbytes < small_bytes:
        # Launch overhead would dominate; a contiguous reshape is metadata.
        return jnp.reshape(x, out_shape)

    return _reshape_alias(x, out_shape)


if __name__ == "__main__":
    key = jax.random.PRNGKey(0)

    # Shapes consistent with the module's use in the Burgers ROM VAE:
    # conv1d feature map (batch=2, channels=4, length=64) flattened to (2, 256).
    batch, channels, length = 2, 4, 64
    x = jax.random.normal(key, (batch, channels, length), dtype=jnp.float32)
    target = (batch, channels * length)
    ref = x.reshape(target)

    # 1) Default path at module-native (small) size: metadata-only fast path.
    out = jax.block_until_ready(reshape_1d(x, target))
    assert out.shape == tuple(target)
    assert out.dtype == x.dtype
    assert bool(jnp.array_equal(out, ref))

    # 2) Zero-copy Pallas path (output aliased to input, empty body), forced
    #    at this small size by disabling the fast-path threshold.
    out_alias = jax.block_until_ready(reshape_1d(x, target, small_bytes=0))
    assert out_alias.shape == tuple(target)
    assert bool(jnp.array_equal(out_alias, ref))

    # 3) Explicit-copy Pallas kernel: single whole-buffer HBM->HBM DMA.
    out_copy = jax.block_until_ready(reshape_1d(x, target, copy=True))
    assert bool(jnp.array_equal(out_copy, ref))

    # 4) Odd flat size + -1 wildcard through the copy kernel (non-128 shapes).
    x2 = jax.random.normal(jax.random.PRNGKey(1), (2, 4, 50), dtype=jnp.float32)
    out2 = jax.block_until_ready(reshape_1d(x2, (2, -1), copy=True))
    assert bool(jnp.array_equal(out2, x2.reshape(2, -1)))

    print("KERNEL_OK")
</pallas_src>

<mosaic_0001>
module attributes {stable_mosaic.version = 11 : i64} {
  func.func @_alias_identity_kernel(%arg0: memref<2x256xf32, #tpu.memory_space<any>>, %arg1: memref<2x256xf32, #tpu.memory_space<any>>) attributes {dimension_semantics = [], scalar_prefetch = 0 : i64, scratch_operands = 0 : i64, tpu.core_type = #tpu.core_type<tc>} {
    return
  }
}

</mosaic_0001>

<bundles_post_ra>
// kernel: tpu_custom_call.1
= control target key start
LH: loop header
LB: loop body
LE: loop exit
PB: predicated region body
PF: predicated region fallthrough
CT: control target
= control target key end

     0   :  { %s16_s0 = inlined_call_operand.hbm [shape: f32[2,256], index: 0, kind: input, shape index: {}, may-alias: {0,1}]   ;;  %s17_s1 = inlined_call_operand.hbm [shape: f32[2,256], index: 1, kind: output, shape index: {}, may-alias: {0,1}]  }

</bundles_post_ra>
